<compile_context>
chip_gen: v5e
topology: v5e:2x2
jax: 0.10.0
libtpu: 0.0.40
codegen_flags: <defaults>
</compile_context>

<pallas_src>
import jax
import jax.numpy as jnp
from jax import lax
from jax.experimental import pallas as pl
from jax.experimental.pallas import tpu as pltpu

_NEG_MASK = -1e30  # large-negative logit for padded (fake) classes


def _round_up(x, m):
    return ((x + m - 1) // m) * m


def _latent_cls_kernel(x_ref, w_ref, b_ref, o_ref):
    # x_ref: (TB, L)   latent tile (native dtype)
    # w_ref: (Cp, L)   classifier weight, class-major, padded to lane-dense Cp
    # b_ref: (1, Cp)   f32 bias; padded classes hold _NEG_MASK
    # o_ref: (TB, Cp)  log-softmax output tile
    x = x_ref[...]
    w = w_ref[...]
    b = b_ref[...]

    # Linear: logits[b, c] = sum_l x[b, l] * w[c, l] + bias[c]
    # Contract on the last dim of BOTH operands (MXU-native, no transpose),
    # accumulate in f32.
    logits = lax.dot_general(
        x, w,
        dimension_numbers=(((1,), (1,)), ((), ())),
        preferred_element_type=jnp.float32,
    ) + b

    # Numerically stable log-softmax over the class axis (f32 throughout).
    # Padded classes carry ~-1e30 logits -> exp() == 0, so they do not
    # perturb the max or the logsumexp of the real classes.
    m = jnp.max(logits, axis=-1, keepdims=True)
    shifted = logits - m
    lse = jnp.log(jnp.sum(jnp.exp(shifted), axis=-1, keepdims=True))
    o_ref[...] = (shifted - lse).astype(o_ref.dtype)


def latent_cls_forward(latent, weight, bias, *, batch_tile=None):
    """latent: (B, L); weight: (C, L); bias: (C,) -> (B, C) log-probs."""
    B, L = latent.shape
    C = weight.shape[0]
    assert weight.shape == (C, L) and bias.shape == (C,)

    # Lane-dense class axis: pad C up to a multiple of 128. Padded weight rows
    # are zero and padded bias entries are a large negative number, so padded
    # classes never affect the real log-softmax; they are sliced away below.
    Cp = _round_up(max(C, 128), 128)
    bias_f32 = bias.astype(jnp.float32)
    if Cp != C:
        weight_p = jnp.pad(weight, ((0, Cp - C), (0, 0)))
        bias_p = jnp.pad(bias_f32, (0, Cp - C), constant_values=_NEG_MASK)
    else:
        weight_p = weight
        bias_p = bias_f32
    bias_p = bias_p.reshape(1, Cp)

    # Batch tile: multiple of 8 (sublane), capped so x/out tiles stay small
    # enough to double-buffer comfortably on v7x's 64 MiB VMEM as well.
    TB = batch_tile or min(128, _round_up(B, 8))
    grid = (pl.cdiv(B, TB),)

    out_p = pl.pallas_call(
        _latent_cls_kernel,
        out_shape=jax.ShapeDtypeStruct((B, Cp), latent.dtype),
        grid=grid,
        in_specs=[
            pl.BlockSpec((TB, L), lambda i: (i, 0)),   # x: tiled over batch
            pl.BlockSpec((Cp, L), lambda i: (0, 0)),   # weight: resident
            pl.BlockSpec((1, Cp), lambda i: (0, 0)),   # bias:   resident
        ],
        out_specs=pl.BlockSpec((TB, Cp), lambda i: (i, 0)),
        compiler_params=pltpu.CompilerParams(
            dimension_semantics=("parallel",),
        ),
    )(latent, weight_p, bias_p)

    return out_p[:, :C] if Cp != C else out_p


if __name__ == "__main__":
    # Shapes implied by the module: latenSize=32, nclass_seen=16, batch=8.
    B, LATENT, NCLASS = 8, 32, 16

    key = jax.random.PRNGKey(0)
    k_x, k_w, k_b = jax.random.split(key, 3)

    latent = jax.random.normal(k_x, (B, LATENT), dtype=jnp.float32)
    # PyTorch-style uniform init with bound 1/sqrt(fan_in).
    bound = 1.0 / (LATENT ** 0.5)
    weight = jax.random.uniform(k_w, (NCLASS, LATENT),
                                minval=-bound, maxval=bound, dtype=jnp.float32)
    bias = jax.random.uniform(k_b, (NCLASS,),
                              minval=-bound, maxval=bound, dtype=jnp.float32)

    out = latent_cls_forward(latent, weight, bias)
    jax.block_until_ready(out)

    # Reference check in plain JAX.
    ref = jax.nn.log_softmax(latent @ weight.T + bias, axis=1)
    assert out.shape == (B, NCLASS)
    assert jnp.allclose(out, ref, atol=1e-5, rtol=1e-5)

    print("KERNEL_OK")
</pallas_src>

<mosaic_0001>
module attributes {stable_mosaic.version = 11 : i64} {
  func.func @_latent_cls_kernel(%arg0: i32, %arg1: memref<8x32xf32, #tpu.memory_space<vmem>>, %arg2: memref<128x32xf32, #tpu.memory_space<vmem>>, %arg3: memref<1x128xf32, #tpu.memory_space<vmem>>, %arg4: memref<8x128xf32, #tpu.memory_space<vmem>>) attributes {dimension_semantics = [#tpu.dimension_semantics<parallel>], iteration_bounds = array<i64: 1>, scalar_prefetch = 0 : i64, scratch_operands = 0 : i64, tpu.core_type = #tpu.core_type<tc>, window_params = [{transform_indices = @transform_0, window_bounds = array<i64: 8, 32>}, {pipeline_mode = #tpu.pipeline_mode<synchronous>, transform_indices = @transform_1, window_bounds = array<i64: 128, 32>}, {pipeline_mode = #tpu.pipeline_mode<synchronous>, transform_indices = @transform_2, window_bounds = array<i64: 1, 128>}, {transform_indices = @transform_3, window_bounds = array<i64: 8, 128>}]} {
    %c0 = arith.constant 0 : index
    %c0_0 = arith.constant 0 : index
    %0 = vector.load %arg1[%c0, %c0_0] : memref<8x32xf32, #tpu.memory_space<vmem>>, vector<8x32xf32>
    %c0_1 = arith.constant 0 : index
    %c0_2 = arith.constant 0 : index
    %1 = vector.load %arg2[%c0_1, %c0_2] : memref<128x32xf32, #tpu.memory_space<vmem>>, vector<128x32xf32>
    %c0_3 = arith.constant 0 : index
    %c0_4 = arith.constant 0 : index
    %2 = vector.load %arg3[%c0_3, %c0_4] : memref<1x128xf32, #tpu.memory_space<vmem>>, vector<1x128xf32>
    %cst = arith.constant dense<0.000000e+00> : vector<8x128xf32>
    %3 = tpu.matmul %0, %1, %cst {dimension_numbers = #tpu.dot_dimension_numbers<[1], [1], [0], [0], [0, 0, 1, 0], [], []>} : vector<8x32xf32>, vector<128x32xf32>, vector<8x128xf32> -> vector<8x128xf32>
    %4 = vector.broadcast %2 : vector<1x128xf32> to vector<8x128xf32>
    %5 = arith.addf %3, %4 : vector<8x128xf32>
    %cst_5 = arith.constant dense<0xFF800000> : vector<8xf32>
    %6 = vector.multi_reduction <maximumf>, %5, %cst_5 [1] : vector<8x128xf32> to vector<8xf32>
    %7 = vector.shape_cast %6 : vector<8xf32> to vector<8x1xf32>
    %8 = vector.broadcast %7 : vector<8x1xf32> to vector<8x128xf32>
    %9 = arith.subf %5, %8 : vector<8x128xf32>
    %10 = math.exp %9 : vector<8x128xf32>
    %cst_6 = arith.constant dense<0.000000e+00> : vector<8xf32>
    %11 = vector.multi_reduction <add>, %10, %cst_6 [1] : vector<8x128xf32> to vector<8xf32>
    %12 = vector.shape_cast %11 : vector<8xf32> to vector<8x1xf32>
    %13 = math.log %12 : vector<8x1xf32>
    %14 = vector.broadcast %13 : vector<8x1xf32> to vector<8x128xf32>
    %15 = arith.subf %9, %14 : vector<8x128xf32>
    %c0_7 = arith.constant 0 : index
    %c0_8 = arith.constant 0 : index
    %16 = vector.load %arg4[%c0_7, %c0_8] : memref<8x128xf32, #tpu.memory_space<vmem>>, vector<8x128xf32>
    tpu.vector_store %arg4[%c0_7, %c0_8], %15 {strides = array<i32>} : memref<8x128xf32, #tpu.memory_space<vmem>>, vector<8x128xf32>,
    return
  }
  func.func @transform_0(%arg0: i32) -> (i32, i32) {
    %c0_i32 = arith.constant 0 : i32
    %c0_i32_0 = arith.constant 0 : i32
    return %arg0, %c0_i32 : i32, i32
  }
  func.func @transform_1(%arg0: i32) -> (i32, i32) {
    %c0_i32 = arith.constant 0 : i32
    %c0_i32_0 = arith.constant 0 : i32
    %c0_i32_1 = arith.constant 0 : i32
    return %c0_i32, %c0_i32_0 : i32, i32
  }
  func.func @transform_2(%arg0: i32) -> (i32, i32) {
    %c0_i32 = arith.constant 0 : i32
    %c0_i32_0 = arith.constant 0 : i32
    %c0_i32_1 = arith.constant 0 : i32
    return %c0_i32, %c0_i32_0 : i32, i32
  }
  func.func @transform_3(%arg0: i32) -> (i32, i32) {
    %c0_i32 = arith.constant 0 : i32
    %c0_i32_0 = arith.constant 0 : i32
    return %arg0, %c0_i32 : i32, i32
  }
}

</mosaic_0001>

<bundles_post_ra>
// kernel: tpu_custom_call.1
= control target key start
LH: loop header
LB: loop body
LE: loop exit
PB: predicated region body
PF: predicated region fallthrough
CT: control target
= control target key end

     0   :  { %vm36_vm0 = vcmask 261120   ;;  %s279_s0 = inlined_call_operand.vmem [shape: f32[8,32], index: 0, kind: input, shape index: {}]   ;;  %s280_s1 = inlined_call_operand.vmem [shape: f32[128,32], index: 1, kind: input, shape index: {}]   ;;  %s281_s2 = inlined_call_operand.vmem [shape: f32[1,128], index: 2, kind: input, shape index: {}]   ;;  %s282_s3 = inlined_call_operand.hbm [shape: f32[8,128], index: 3, kind: output, shape index: {}]  }
   0x1   :  { %v31_v0 = vld [vmem:[%s280_s1 + $0x78] sm:$0xff]  ;;  %v30_v1 = vld [vmem:[%s280_s1 + $0x70] sm:$0xff] }
   0x2   :  { %135 = vmatpush.xpose.msk.msra.mxu0 %vm36_vm0, %v31_v0 }
   0x3   :  { %8 = vsyncpa [#allocation3], 0  ;;  %v29_v2 = vld [vmem:[%s280_s1 + $0x68] sm:$0xff]  ;;  %v28_v3 = vld [vmem:[%s280_s1 + $0x60] sm:$0xff]  ;;  %s126_s23 = sshll.u32 %s282_s3, 4  ;;  %s127_s23 = int_to_ptr.hbm [resolvable:$true] %s126_s23 }
   0x4   :  { %v27_v4 = vld [vmem:[%s280_s1 + $0x58] sm:$0xff]  ;;  %v26_v5 = vld [vmem:[%s280_s1 + $0x50] sm:$0xff]  ;;  %v25_v6 = vld [vmem:[%s280_s1 + $0x48] sm:$0xff] }
   0x5   :  { %v24_v7 = vld [vmem:[%s280_s1 + $0x40] sm:$0xff]  ;;  %v23_v8 = vld [vmem:[%s280_s1 + $0x38] sm:$0xff]  ;;  %v22_v9 = vld [vmem:[%s280_s1 + $0x30] sm:$0xff] }
   0x6   :  { %136 = vmatpush.xpose.msk.msra.mxu0 %vm36_vm0, %v30_v1  ;;  %v21_v10 = vld [vmem:[%s280_s1 + $0x28] sm:$0xff]  ;;  %v20_v11 = vld [vmem:[%s280_s1 + $0x20] sm:$0xff]  ;;  %v19_v12 = vld [vmem:[%s280_s1 + $0x18] sm:$0xff] }
   0x7   :  { %v18_v13 = vld [vmem:[%s280_s1 + $0x10] sm:$0xff]  ;;  %v17_v14 = vld [vmem:[%s280_s1 + $0x8] sm:$0xff]  ;;  %v16_v15 = vld [vmem:[%s280_s1] sm:$0xff]  ;;  %s184_s1 = smov [#allocation2]  }
   0x8   :  { %v15_v16 = vld [vmem:[%s279_s0] sm:$0xff]  ;;  %s124_s0 = sshll.u32 %s184_s1, 4  ;;  %s125_s0 = int_to_ptr.vmem [resolvable:$true] %s124_s0 }
   0x9   :  { %v153_v17 = vld [vmem:[%s281_s2] ss:$0 sm:$0xff] }
   0xa   :  { %137 = vmatpush.xpose.msk.msra.mxu0 %vm36_vm0, %v29_v2 }
   0xe   :  { %138 = vmatpush.xpose.msk.msra.mxu0 %vm36_vm0, %v28_v3 }
  0x12   :  { %139 = vmatpush.xpose.msk.msra.mxu0 %vm36_vm0, %v27_v4 }
  0x16   :  { %140 = vmatpush.xpose.msk.msra.mxu0 %vm36_vm0, %v26_v5 }
  0x1a   :  { %141 = vmatpush.xpose.msk.msra.mxu0 %vm36_vm0, %v25_v6 }
  0x1e   :  { %142 = vmatpush.xpose.msk.msra.mxu0 %vm36_vm0, %v24_v7 }
  0x22   :  { %143 = vmatpush.xpose.msk.msra.mxu0 %vm36_vm0, %v23_v8 }
  0x26   :  { %144 = vmatpush.xpose.msk.msra.mxu0 %vm36_vm0, %v22_v9 }
  0x2a   :  { %145 = vmatpush.xpose.msk.msra.mxu0 %vm36_vm0, %v21_v10 }
  0x2e   :  { %146 = vmatpush.xpose.msk.msra.mxu0 %vm36_vm0, %v20_v11 }
  0x32   :  { %147 = vmatpush.xpose.msk.msra.mxu0 %vm36_vm0, %v19_v12 }
  0x36   :  { %148 = vmatpush.xpose.msk.msra.mxu0 %vm36_vm0, %v18_v13 }
  0x3a   :  { %149 = vmatpush.xpose.msk.msra.mxu0 %vm36_vm0, %v17_v14 }
  0x3e   :  { %150 = vmatpush.xpose.msk.msra.mxu0 %vm36_vm0, %v16_v15 }
  0x41   :  { %151 = vmatmul.msk.f32.vlgmr.msra.gmra.mxu0 %vm36_vm0, %v15_v16 }
  0xbe   :  { %v105_v18 = vpop.f32.mrf.mxu0 }
  0xbf   :  { %v106_v19 = vadd.f32 %v153_v17, %v105_v18 }
  0xc1   :  { %108 = vmax.xlane.f32.xlu0 %v106_v19 }
 0x134   :  { %v109_v20 = vpop.xlane.xlu0 %108 }
 0x135   :  { %v110_v21 = vsub.f32 %v106_v19, %v109_v20 }
 0x137   :  { %v111_v22 = vmul.f32 1.442695, %v110_v21 }
 0x139   :  { %154 = vpow2.f32 %v111_v22 }
 0x13f   :  { %v155_v23 = vpop.eup %154 }
 0x140   :  { %113 = vadd.xlane.f32.xlu0 %v155_v23 }
 0x1b3   :  { %v114_v24 = vpop.xlane.xlu0 %113 }
 0x1b4   :  { %156 = vlog2.f32 %v114_v24 }
 0x1ba   :  { %v157_v25 = vpop.eup %156 }
 0x1bb   :  { %v116_v26 = vmul.f32 0.6931472, %v157_v25 }
 0x1bd   :  { %v117_v27 = vsub.f32 %v110_v21, %v116_v26 }
 0x1bf   :  { %118 = vst [vmem:[#allocation2] sm:$0xff] %v117_v27 }
 0x1c0   :  { %129 = dma.vmem_to_hbm [thread:$0]  %s125_s0, 128, %s127_s23, [#allocation3]  }
 0x1c1   :  { %182 = dma.done.wait [#allocation3], 128  }
 0x1c2   :  { %183 = vsyncadd [#allocation3], 4294967168 }
 0x1c3   :  { %134 = vsyncpa [#allocation3], 1 }

</bundles_post_ra>
